<compile_context>
chip_gen: v5e
topology: v5e:2x2
jax: 0.10.0
libtpu: 0.0.40
codegen_flags: <defaults>
</compile_context>

<pallas_src>
import functools

import jax
import jax.numpy as jnp
from jax.experimental import pallas as pl
from jax.experimental.pallas import tpu as pltpu


_MAX_BANDED_C = 512   # largest C for which the (C, C) banded conv matrix is
                      # cheap (<= 1 MiB, loaded once); bigger C avoids O(C^2).


# --------------------------------------------------------------------------- #
# Kernels
# --------------------------------------------------------------------------- #

def _eca_fused_kernel(tt_ref, x_ref, o_ref):
    """Fused ECA for a block of B_TILE images.

    tt_ref: (C, C)          transposed banded conv1d weights, 1/(H*W) folded in
    x_ref : (B_TILE, C, HW) activations (channels on sublanes, spatial on lanes)
    o_ref : (B_TILE, C, HW)
    """
    x = x_ref[...]
    # Global average pool: accumulate in f32 regardless of activation dtype.
    s = jnp.sum(x.astype(jnp.float32), axis=-1)                       # (B, C)
    # Conv1d(k, pad=(k-1)//2, no bias) over channels == banded matmul (MXU).
    z = jnp.dot(s, tt_ref[...], preferred_element_type=jnp.float32)   # (B, C)
    gate = 1.0 / (1.0 + jnp.exp(-z))                                   # sigmoid
    o_ref[...] = (x * gate[:, :, None].astype(x.dtype)).astype(o_ref.dtype)


def _eca_pool_kernel(x_ref, sum_ref, *, hw_total, hw_tile):
    """Spatially-tiled global sum: f32 channel sums accumulated over HW tiles."""
    h = pl.program_id(1)

    @pl.when(h == 0)
    def _():
        sum_ref[...] = jnp.zeros_like(sum_ref)

    x = x_ref[...]                                               # (1, C, hw_tile)
    lane = jax.lax.broadcasted_iota(jnp.int32, x.shape, 2)
    valid = lane < (hw_total - h * hw_tile)        # mask the ragged last tile
    xm = jnp.where(valid, x.astype(jnp.float32), 0.0)
    sum_ref[...] += jnp.sum(xm, axis=-1, keepdims=True)          # (1, C, 1)


def _eca_scale_kernel(g_ref, x_ref, o_ref):
    """out = x * gate, streaming HW tiles (second read pass over x)."""
    x = x_ref[...]                                               # (1, C, hw_tile)
    o_ref[...] = (x * g_ref[...].astype(x.dtype)).astype(o_ref.dtype)


# --------------------------------------------------------------------------- #
# Host-side helpers
# --------------------------------------------------------------------------- #

def _conv1d_as_banded_matrix(conv_w, channels, hw):
    """Fold Conv1d(1,1,k, pad=(k-1)//2, no bias) and the 1/(H*W) mean into a
    banded matrix, returned transposed so the kernel computes z = s @ T^T."""
    k_size = conv_w.shape[0]
    pad = (k_size - 1) // 2
    i = jnp.arange(channels)[:, None]
    j = jnp.arange(channels)[None, :]
    tap = j - i + pad                    # conv tap connecting channel j -> i
    valid = (tap >= 0) & (tap < k_size)
    t = jnp.where(valid, conv_w[jnp.clip(tap, 0, k_size - 1)], 0.0)
    return (t / float(hw)).astype(jnp.float32).T


def _channel_conv_sigmoid(mean, conv_w):
    """O(k*C) channel conv + sigmoid on the tiny pooled (N, C) tensor."""
    _, c = mean.shape
    k_size = conv_w.shape[0]
    pad = (k_size - 1) // 2
    mp = jnp.pad(mean, ((0, 0), (pad, pad)))
    z = sum(conv_w[t] * mp[:, t:t + c] for t in range(k_size))
    return 1.0 / (1.0 + jnp.exp(-z))


def _pick_batch_tile(n, per_image_bytes, target_bytes):
    """Largest divisor of n with block <= target_bytes, keeping >= 2 grid steps
    (when n allows) so both v7x TensorCores receive work on the parallel axis."""
    best = 1
    for b in range(1, n + 1):
        if n % b:
            continue
        if b * per_image_bytes > target_bytes:
            break
        if n >= 2 and n // b < 2:
            break
        best = b
    return best


def _vmem_limit(*block_bytes):
    """VMEM budget from the actual block sizes (x2 for double buffering) plus
    headroom for Mosaic-internal scratch — no hard-coded 32 MiB.  For the
    default 2 MiB block target this stays far below every generation's
    physical VMEM (128 MiB v5e/v6e, 64 MiB v7x); raise block_target_bytes per
    generation if larger blocks are wanted."""
    return int(max(2 * sum(block_bytes) + (4 << 20), 16 << 20))


# --------------------------------------------------------------------------- #
# Paths
# --------------------------------------------------------------------------- #

def _eca_fused(x2, conv_w, block_target_bytes):
    n, c, hw = x2.shape
    per_image = c * hw * x2.dtype.itemsize
    b_tile = _pick_batch_tile(n, per_image, block_target_bytes)
    block_bytes = b_tile * per_image

    tt = _conv1d_as_banded_matrix(conv_w, c, hw)                 # (C, C) f32
    # NOTE: the weight block index is constant, so it is DMA'd only once; at
    # C <= 512 its double-buffered VMEM footprint is <= 2 MiB (pl.Buffered(1)
    # would halve that but is not worth it at this size).
    return pl.pallas_call(
        _eca_fused_kernel,
        out_shape=jax.ShapeDtypeStruct((n, c, hw), x2.dtype),
        grid_spec=pltpu.PrefetchScalarGridSpec(
            num_scalar_prefetch=0,
            grid=(n // b_tile,),
            in_specs=[
                pl.BlockSpec((c, c), lambda i: (0, 0)),
                pl.BlockSpec((b_tile, c, hw), lambda i: (i, 0, 0)),
            ],
            out_specs=pl.BlockSpec((b_tile, c, hw), lambda i: (i, 0, 0)),
        ),
        compiler_params=pltpu.CompilerParams(
            dimension_semantics=("parallel",),
            vmem_limit_bytes=_vmem_limit(block_bytes, block_bytes, c * c * 4),
        ),
    )(tt, x2)


def _eca_two_pass(x2, conv_w, block_target_bytes):
    n, c, hw = x2.shape
    itemsize = x2.dtype.itemsize
    hw_tile = max(128, (block_target_bytes // (c * itemsize)) // 128 * 128)
    hw_tile = min(hw_tile, hw)
    n_hw = pl.cdiv(hw, hw_tile)
    tile_bytes = c * hw_tile * itemsize

    # Pass 1: spatially tiled global sum (f32 accumulator stays resident
    # across the "arbitrary" HW axis).
    sums = pl.pallas_call(
        functools.partial(_eca_pool_kernel, hw_total=hw, hw_tile=hw_tile),
        out_shape=jax.ShapeDtypeStruct((n, c, 1), jnp.float32),
        grid_spec=pltpu.PrefetchScalarGridSpec(
            num_scalar_prefetch=0,
            grid=(n, n_hw),
            in_specs=[pl.BlockSpec((1, c, hw_tile), lambda b, h: (b, 0, h))],
            out_specs=pl.BlockSpec((1, c, 1), lambda b, h: (b, 0, 0)),
        ),
        compiler_params=pltpu.CompilerParams(
            dimension_semantics=("parallel", "arbitrary"),
            vmem_limit_bytes=_vmem_limit(tile_bytes, c * 4),
        ),
    )(x2)

    # Tiny (N, C) channel conv + sigmoid: O(k*C), no (C, C) matrix anywhere.
    gate = _channel_conv_sigmoid(sums[:, :, 0] / float(hw), conv_w)
    gate = gate[:, :, None].astype(jnp.float32)                   # (N, C, 1)

    # Pass 2: rescale, streaming HW tiles (accepts a second read of x).
    return pl.pallas_call(
        _eca_scale_kernel,
        out_shape=jax.ShapeDtypeStruct((n, c, hw), x2.dtype),
        grid_spec=pltpu.PrefetchScalarGridSpec(
            num_scalar_prefetch=0,
            grid=(n, n_hw),
            in_specs=[
                pl.BlockSpec((1, c, 1), lambda b, h: (b, 0, 0)),
                pl.BlockSpec((1, c, hw_tile), lambda b, h: (b, 0, h)),
            ],
            out_specs=pl.BlockSpec((1, c, hw_tile), lambda b, h: (b, 0, h)),
        ),
        compiler_params=pltpu.CompilerParams(
            dimension_semantics=("parallel", "parallel"),
            vmem_limit_bytes=_vmem_limit(2 * tile_bytes, c * 4),
        ),
    )(gate, x2)


def eca_forward(x_nchw, conv_w, *, block_target_bytes=2 << 20,
                two_pass_threshold_bytes=8 << 20, force_two_pass=False):
    """ECA.forward.  x_nchw: (N, C, H, W); conv_w: (k,) Conv1d weights."""
    n, c, h, w = x_nchw.shape
    hw = h * w
    x2 = x_nchw.reshape(n, c, hw)          # free: NCHW is channel-major
    per_image_bytes = c * hw * x2.dtype.itemsize
    use_two_pass = (
        force_two_pass
        or per_image_bytes > two_pass_threshold_bytes   # image won't fit VMEM budget (v7x first)
        or c > _MAX_BANDED_C                            # avoid O(C^2) conv weights
    )
    if use_two_pass:
        out = _eca_two_pass(x2, conv_w, block_target_bytes)
    else:
        out = _eca_fused(x2, conv_w, block_target_bytes)
    return out.reshape(n, c, h, w)


# --------------------------------------------------------------------------- #
# Pure-JAX reference (NCHW) and tests
# --------------------------------------------------------------------------- #

def eca_ref(x, conv_w, k_size=3):
    _, c, _, _ = x.shape
    pad = (k_size - 1) // 2
    y = jnp.mean(x, axis=(2, 3))                         # avg_pool -> (N, C)
    yp = jnp.pad(y, ((0, 0), (pad, pad)))                # zero-pad along channels
    conv = sum(conv_w[k] * yp[:, k:k + c] for k in range(k_size))
    gate = jax.nn.sigmoid(conv)                          # (N, C)
    return x * gate[:, :, None, None]


if __name__ == "__main__":
    key = jax.random.PRNGKey(0)
    kw, k1, k2, k3, k4, k5 = jax.random.split(key, 6)
    k_size = 3
    conv_w = 0.5 * jax.random.normal(kw, (k_size,), jnp.float32)

    def check(name, x, atol=1e-4, rtol=1e-4, **kwargs):
        out = jax.block_until_ready(eca_forward(x, conv_w, **kwargs))
        ref = eca_ref(x.astype(jnp.float32), conv_w, k_size)
        assert out.shape == x.shape and out.dtype == x.dtype, name
        ok = jnp.allclose(out.astype(jnp.float32), ref, atol=atol, rtol=rtol)
        assert ok, f"ECA mismatch: {name}"

    # Spec-like shape (batch=2, channels=4, spatial=16): fused banded path.
    check("c4", jax.random.normal(k1, (2, 4, 16, 16), jnp.float32))
    # Batch-tiled fused path (B_TILE=4 -> 2 grid steps for megacore).
    check("c16_batched", jax.random.normal(k2, (8, 16, 16, 16), jnp.float32))
    # Large channel count -> O(k*C) two-pass path (no (C, C) matrix).
    check("c768", jax.random.normal(k3, (2, 768, 8, 8), jnp.float32))
    # bf16 activations: half the HBM bytes, pool still accumulated in f32.
    check("bf16",
          jax.random.normal(k4, (2, 16, 16, 16), jnp.float32).astype(jnp.bfloat16),
          atol=5e-2, rtol=2e-2)
    # Spatially tiled two-pass path with a ragged HW (144 = 128 + 16) axis.
    check("two_pass_ragged", jax.random.normal(k5, (2, 8, 12, 12), jnp.float32),
          force_two_pass=True, block_target_bytes=4096)

    print("KERNEL_OK")
</pallas_src>

<mosaic_0001>
module attributes {stable_mosaic.version = 11 : i64} {
  func.func @_eca_fused_kernel(%arg0: i32, %arg1: memref<4x4xf32, #tpu.memory_space<vmem>>, %arg2: memref<1x4x256xf32, #tpu.memory_space<vmem>>, %arg3: memref<1x4x256xf32, #tpu.memory_space<vmem>>) attributes {dimension_semantics = [#tpu.dimension_semantics<parallel>], iteration_bounds = array<i64: 2>, scalar_prefetch = 0 : i64, scratch_operands = 0 : i64, tpu.core_type = #tpu.core_type<tc>, window_params = [{pipeline_mode = #tpu.pipeline_mode<synchronous>, transform_indices = @transform_0, window_bounds = array<i64: 4, 4>}, {transform_indices = @transform_1, window_bounds = array<i64: 1, 4, 256>}, {transform_indices = @transform_2, window_bounds = array<i64: 1, 4, 256>}]} {
    %c0 = arith.constant 0 : index
    %c0_0 = arith.constant 0 : index
    %c0_1 = arith.constant 0 : index
    %0 = vector.load %arg2[%c0, %c0_0, %c0_1] : memref<1x4x256xf32, #tpu.memory_space<vmem>>, vector<1x4x256xf32>
    %cst = arith.constant dense<0.000000e+00> : vector<1x4xf32>
    %1 = vector.multi_reduction <add>, %0, %cst [2] : vector<1x4x256xf32> to vector<1x4xf32>
    %c0_2 = arith.constant 0 : index
    %c0_3 = arith.constant 0 : index
    %2 = vector.load %arg1[%c0_2, %c0_3] : memref<4x4xf32, #tpu.memory_space<vmem>>, vector<4x4xf32>
    %cst_4 = arith.constant dense<0.000000e+00> : vector<1x4xf32>
    %3 = tpu.matmul %1, %2, %cst_4 {dimension_numbers = #tpu.dot_dimension_numbers<[1], [0], [0], [1], [0, 0, 1, 1], [], []>} : vector<1x4xf32>, vector<4x4xf32>, vector<1x4xf32> -> vector<1x4xf32>
    %cst_5 = arith.constant 0.000000e+00 : f32
    %4 = vector.broadcast %cst_5 : f32 to vector<1x4xf32>
    %5 = arith.subf %4, %3 : vector<1x4xf32>
    %6 = math.exp %5 : vector<1x4xf32>
    %cst_6 = arith.constant 1.000000e+00 : f32
    %7 = vector.broadcast %cst_6 : f32 to vector<1x4xf32>
    %8 = arith.addf %7, %6 : vector<1x4xf32>
    %cst_7 = arith.constant 1.000000e+00 : f32
    %9 = vector.broadcast %cst_7 : f32 to vector<1x4xf32>
    %10 = arith.divf %9, %8 : vector<1x4xf32>
    %11 = vector.shape_cast %10 : vector<1x4xf32> to vector<1x4x1xf32>
    %12 = vector.broadcast %11 : vector<1x4x1xf32> to vector<1x4x256xf32>
    %13 = arith.mulf %0, %12 : vector<1x4x256xf32>
    %c0_8 = arith.constant 0 : index
    %c0_9 = arith.constant 0 : index
    %c0_10 = arith.constant 0 : index
    %14 = vector.load %arg3[%c0_8, %c0_9, %c0_10] : memref<1x4x256xf32, #tpu.memory_space<vmem>>, vector<1x4x256xf32>
    tpu.vector_store %arg3[%c0_8, %c0_9, %c0_10], %13 {strides = array<i32>} : memref<1x4x256xf32, #tpu.memory_space<vmem>>, vector<1x4x256xf32>,
    return
  }
  func.func @transform_0(%arg0: i32) -> (i32, i32) {
    %c0_i32 = arith.constant 0 : i32
    %c0_i32_0 = arith.constant 0 : i32
    %c0_i32_1 = arith.constant 0 : i32
    return %c0_i32, %c0_i32_0 : i32, i32
  }
  func.func @transform_1(%arg0: i32) -> (i32, i32, i32) {
    %c0_i32 = arith.constant 0 : i32
    %c0_i32_0 = arith.constant 0 : i32
    %c0_i32_1 = arith.constant 0 : i32
    return %arg0, %c0_i32, %c0_i32_0 : i32, i32, i32
  }
  func.func @transform_2(%arg0: i32) -> (i32, i32, i32) {
    %c0_i32 = arith.constant 0 : i32
    %c0_i32_0 = arith.constant 0 : i32
    %c0_i32_1 = arith.constant 0 : i32
    return %arg0, %c0_i32, %c0_i32_0 : i32, i32, i32
  }
}

</mosaic_0001>

<bundles_post_ra>
// kernel: tpu_custom_call.1
= control target key start
LH: loop header
LB: loop body
LE: loop exit
PB: predicated region body
PF: predicated region fallthrough
CT: control target
= control target key end

     0   :  { %7 = vsyncpa [#allocation3], 0  ;;  %s728_s0 = inlined_call_operand.hbm [shape: f32[4,4], index: 0, kind: input, shape index: {}]   ;;  %s729_s1 = inlined_call_operand.hbm [shape: f32[2,4,256], index: 1, kind: input, shape index: {}]   ;;  %s730_s2 = inlined_call_operand.hbm [shape: f32[2,4,256], index: 2, kind: output, shape index: {}]  }
   0x1   :  { %8 = vsyncpa [#allocation6], 0 }
   0x2   :  { %10 = vsyncpa [#allocation6 + $0x1], 0 }
   0x3   :  { %11 = vsyncpa [#allocation4], 0 }
   0x4   :  { %13 = vsyncpa [#allocation4 + $0x1], 0  ;;  %s586_s9 = smov 0   ;;  %s588_s10 = smov 0  }
   0x5   :  { %s590_s11 = smov 0   ;;  %s592_s12 = smov 0  }
   0x6 LB: > { %s607_s13 = sadd.s32 4294967295, %s567_s12   ;;  %s354_s14 = sadd.s32 4294967294, %s567_s12   ;;  %s567_s12 = sphi %s592_s12, %s740_s12   ;;  %s563_s11 = sphi %s590_s11, %s739_s11   ;;  %s559_s10 = sphi %s588_s10, %s738_s10   ;;  %s555_s9 = sphi %s586_s9, %s737_s9  }
   0x7   : > { %p60_p0 = scmp.ne.s32.totalorder %s559_s10, %s555_s9  ;;  %p61_p1 = scmp.eq.s32.totalorder %s607_s13, 0 }
   0x8   : > { %p84_p2 = scmp.eq.s32.totalorder %s607_s13, 1  ;;  %p90_p3 = scmp.eq.s32.totalorder %s354_s14, 1 }
   0x9   : > { %p616_p4 = por %p61_p1, %p60_p0  ;;  %p355_p5 = scmp.ge.s32.totalorder %s567_s12, 1 }
   0xa   : > { %p621_p6 = por %p90_p3, %p60_p0  ;;  %p97_p7 = scmp.lt.s32.totalorder %s567_s12, 3 }
   0xb   : > { %s109_s19 = sshll.u32 %s728_s0, 4  ;;  %s569_s21 = smov [#allocation2]   ;;  %s110_s19 = int_to_ptr.hbm [resolvable:$true] %s109_s19 }
   0xc   : > { %p629_p8 = pnand %p355_p5, %p97_p7  ;;  %s111_s22 = sshll.u32 %s569_s21, 4  ;;  %s112_s22 = int_to_ptr.vmem [resolvable:$true] %s111_s22 }
   0xd   : > { %s639_s23 = sadd.s32 1, %s567_s12   ;;  %s47_s24 = sadd.s32 1, %s563_s11 }
   0xe   : > { %p382_p10 = pneg %p629_p8  ;;  %s44_s25 = ssub.s32 %s567_s12, %s639_s23 }
   0xf   : > { %p45_p12 = scmp.eq.s32.totalorder %s44_s25, 0  ;;  %p54_p13 = scmp.ne.s32.totalorder %s563_s11, %s559_s10 }
  0x10   : > { %p383_p11 = pnand %p382_p10, %p61_p1  ;;  %p55_p0 = scmp.eq.s32.totalorder %s567_s12, 0 }
  0x11   : > { %s648_s26 = scalar_select %p45_p12, %s563_s11, %s47_s24  }
  0x12   : > { %385 = dma.hbm_to_vmem [thread:$0]  (!%p383_p11), %s110_s19, 64, %s112_s22, [#allocation3]  }
  0x13   : > { %p652_p3 = por %p84_p2, %p54_p13  ;;  %p395_p5 = scmp.lt.s32.totalorder %s567_s12, 2 }
  0x14   : > { %s122_s28 = sand.u32 1, %s563_s11   ;;  %s372_s29 = sshll.u32 %s567_s12, 3 }
  0x15   : > { %p56_p7 = por %p55_p0, %p54_p13  ;;  %s358_s30 = sshll.u32 %s122_s28, 3 }
  0x16   : > { %s131_s5 = scalar_lea.hbm %s729_s1, %s372_s29  ;;  %s126_s7 = scalar_lea.vmem [#allocation5], %s358_s30 }
  0x17   : > { %s133_s6 = sshll.u32 %s131_s5, 4  ;;  %s135_s8 = sshll.u32 %s126_s7, 4  ;;  %s134_s6 = int_to_ptr.hbm [resolvable:$true] %s133_s6  ;;  %s136_s8 = int_to_ptr.vmem [resolvable:$true] %s135_s8 }
  0x18   : > { %p662_p10 = pnand %p395_p5, %p56_p7  ;;  %s123_s17 = scalar_lea.sflag [#allocation6], %s122_s28 }
  0x19   : > { %s467_s18 = sshra.s32 %s134_s6, 4  ;;  %s474_s24 = scalar_lea.hbm %s729_s1, 16  ;;  %s468_s18 = int_to_ptr.hbm [resolvable:$true] %s467_s18 }
  0x1a   : > { %s469_s19 = scalar_lea.hbm %s468_s18, 8  ;;  %p471_p11 = pneg %p662_p10 }
  0x1b   : > { %p470_p2 = scmp.ne.s32.totalorder %s468_s18, %s469_s19  ;;  %p475_p0 = scmp.lt.s32.totalorder %s468_s18, %s729_s1 }
  0x1c   : > { %p476_p5 = scmp.lt.s32.totalorder %s474_s24, %s469_s19 }
  0x1d   : > { %p472_p12 = pnand %p471_p11, %p470_p2 }
  0x1e   : > { %p477_p7 = por %p476_p5, %p475_p0 }
  0x1f   : > { %p473_p13 = pneg %p472_p12 }
  0x21   : > { %p478_p9 = pnand %p477_p7, %p473_p13 }
  0x23   : > { %481 = shalt.err (!%p478_p9)
}
  0x24   : > { %389 = dma.hbm_to_vmem [thread:$0]  (!%p662_p10), %s134_s6, 128, %s136_s8, %s123_s17  }
  0x25   : > { %144 = sbr.rel (%p629_p8) target bundleno = 457 (0x1c9), region = 28 }
  0x2a   : > { %542 = dma.done.wait (%p61_p1), [#allocation3], 64  }
  0x2b   : > { %544 = vsyncadd (%p61_p1), [#allocation3], 4294967232  ;;  %s683_s28 = sand.u32 1, %s559_s10  }
  0x2c   : > { %s363_s30 = sshll.u32 %s683_s28, 3  ;;  %s152_s3 = scalar_lea.sflag [#allocation6], %s683_s28 }
  0x2d   : > { %s155_s4 = scalar_lea.vmem [#allocation5], %s363_s30 }
  0x2e   : > { %546 = dma.done.wait (%p616_p4), %s152_s3, 128  }
  0x2f   : > { %548 = vsyncadd (%p616_p4), %s152_s3, 4294967168  ;;  %v177_v0 = vld [vmem:[%s155_s4] sm:$0xff]  ;;  %vm184_vm0 = vcmask 1043456   ;;  %v190_v6 = vld [vmem:[#allocation2] sm:$0xf]  ;;  %v192_v7 = vlaneseq  ;;  %vm195_vm1 = vcmask 31744  }
  0x30   : > { %179 = vst [vmem:[#allocation1] ss:$2 sm:$0xff] %v177_v0  ;;  %365 = vmatpush.msk.msra.mxu0 %vm184_vm0, %v190_v6  ;;  %v570_v28 = vmov 839922192   ;;  %s373_s15 = sshll.u32 %s607_s13, 3  ;;  %s176_s7 = scalar_lea.vmem [#allocation7], %s363_s30 }
  0x31   : > { %v193_v8 = vand.u32 127, %v192_v7  ;;  %v242_v11 = vshrl.u32 %v192_v7, 7  ;;  %v249_v29 = vunpack.c.l.s4 %v570_v28  ;;  %s267_s6 = scalar_lea.hbm %s730_s2, %s373_s15  ;;  %s269_s8 = sshll.u32 %s176_s7, 4  ;;  %s270_s8 = int_to_ptr.vmem [resolvable:$true] %s269_s8 }
  0x32   : > { %s271_s14 = sshll.u32 %s267_s6, 4  ;;  %s256_s17 = scalar_lea.sflag [#allocation4], %s683_s28  ;;  %s272_s14 = int_to_ptr.hbm [resolvable:$true] %s271_s14 }
  0x33   : > { %432 = vset.pattern.permute.xlu0 %v242_v11  ;;  %v250_v30 = vunpack.c.0.s8 %v249_v29  ;;  %s511_s18 = sshra.s32 %s272_s14, 4  ;;  %s517_s22 = scalar_lea.hbm %s730_s2, 16  ;;  %s512_s18 = int_to_ptr.hbm [resolvable:$true] %s511_s18 }
  0x34   : > { %s513_s13 = scalar_lea.hbm %s512_s18, 8  ;;  %p518_p9 = scmp.lt.s32.totalorder %s512_s18, %s730_s2 }
  0x35   : > { %p514_p1 = scmp.ne.s32.totalorder %s512_s18, %s513_s13  ;;  %p519_p10 = scmp.lt.s32.totalorder %s517_s22, %s513_s13 }
  0x37   : > { %v180_v1 = vld.sshfl [vmem:[#allocation1] sm:$0xff pattern:$0x75316420]  ;;  %v181_v2 = vld.sshfl [vmem:[#allocation1 + $0x8] sm:$0xff pattern:$0x75316420]  ;;  %p515_p4 = pnand %p514_p1, %p652_p3  ;;  %p520_p2 = por %p519_p10, %p518_p9 }
  0x38   : > { %v185_v3 = vsel %vm184_vm0, %v180_v1, 0.0  ;;  %v186_v4 = vsel %vm184_vm0, %v181_v2, 0.0 }
  0x39   : > { %v187_v5 = vadd.f32 %v186_v4, %v185_v3  ;;  %p516_p8 = pneg %p515_p4 }
  0x3b   : > { %188 = vadd.xlane.f32.xlu0 %v187_v5  ;;  %p521_p11 = pnand %p520_p2, %p516_p8 }
  0xae   : > { %v189_v9 = vpop.xlane.xlu0 %188 }
  0xaf   : > { %v194_v10 = vperm.slane %v189_v9, %v193_v8 }
  0xb1   : > { %366 = vmatmul.msk.f32.vlgmr.msra.gmra.mxu0 %vm195_vm1, %v194_v10 }
 0x12e   : > { %v218_v12 = vpop.f32.mrf.mxu0 }
 0x12f   : > { %v221_v13 = vsub.f32 0.0, %v218_v12 }
 0x131   : > { %v222_v14 = vmul.f32 1.442695, %v221_v13 }
 0x133   : > { %433 = vpow2.f32 %v222_v14 }
 0x139   : > { %v434_v15 = vpop.eup %433 }
 0x13a   : > { %v224_v16 = vadd.f32 1.0, %v434_v15 }
 0x13c   : > { %435 = vrcp.f32 %v224_v16  ;;  %v236_v20 = vand.u32 2147483648, %v224_v16  ;;  %v234_v22 = vand.u32 2147483647, %v224_v16  ;;  %vm230_vm3 = vweird.f32 %v224_v16 }
 0x13e   : > { %v237_v24 = vor.u32 1.1754944e-38, %v236_v20  ;;  %vm235_vm5 = vcmp.eq.f32.partialorder %v234_v22, 8.507059e+37 }
 0x142   : > { %v436_v17 = vpop.eup %435 }
 0x143   : > { %v226_v18 = vmul.f32 %v436_v17, %v224_v16  ;;  %vm231_vm2 = vweird.f32 %v436_v17 }
 0x144   : > { %vm232_vm4 = vmor %vm230_vm3, %vm231_vm2 }
 0x145   : > { %v227_v19 = vsub.f32 1.0, %v226_v18 }
 0x147   : > { %v228_v21 = vmul.f32 %v436_v17, %v227_v19 }
 0x149   : > { %v229_v23 = vadd.f32 %v436_v17, %v228_v21 }
 0x14b   : > { %v233_v25 = vsel %vm232_vm4, %v436_v17, %v229_v23 }
 0x14c   : > { %v238_v26 = vsel %vm235_vm5, %v237_v24, %v233_v25 }
 0x14d   : > { %v240_v27 = vperm.slane %v238_v26, 0 }
 0x14f   : > { %245 = vperm.xlu0 %432, %v240_v27  }
 0x1c1   : > { %v246_v31 = vpop.permute.xlu0 %245 }
 0x1c2   : > { %v251_v32 = vperm.slane %v246_v31, %v250_v30 }
 0x1c4   : > { %v253_v33 = vmul.f32 %v251_v32, %v177_v0 }
 0x1c6   : > { %254 = vst [vmem:[%s176_s7] sm:$0xff] %v253_v33 }
 0x1c7   : > { %524 = shalt.err (!%p521_p11)
}
 0x1c8   : > { %380 = dma.vmem_to_hbm [thread:$0]  (%p652_p3), %s270_s8, 128, %s272_s14, %s256_s17  }
 0x1c9 PF: > { %s283_s29 = sand.u32 1, %s555_s9   ;;  %p736_p12 = scmp.ge.s32.totalorder %s567_s12, 2 }
 0x1ca   : > { %s284_s28 = scalar_lea.sflag [#allocation4], %s283_s29 }
 0x1cb   : > { %p391_p13 = pnand %p736_p12, %p621_p6 }
 0x1cd   : > { %p392_p0 = pneg %p391_p13 }
 0x1cf   : > { %550 = dma.done.wait (%p392_p0), %s284_s28, 128  }
 0x1d0   : > { %552 = vsyncadd (%p392_p0), %s284_s28, 4294967168  ;;  %p16_p5 = scmp.ge.s32.totalorder %s639_s23, 4   ;;  %s737_s9 = smov %s559_s10 }
 0x1d1   : > { %s738_s10 = smov %s563_s11  ;;  %s739_s11 = smov %s648_s26 }
 0x1d2   : > { %s740_s12 = smov %s639_s23  ;;  %18 = sbr.rel (!%p16_p5) target bundleno = 6 (0x6), region = 78 }
 0x1d7   :  { %290 = vsyncpa [#allocation3], 1 }
 0x1d8   :  { %292 = vsyncpa [#allocation3 + $0x1], 1 }
 0x1d9   :  { %293 = vsyncpa [#allocation6], 1 }
 0x1da   :  { %295 = vsyncpa [#allocation6 + $0x1], 1 }
 0x1db   :  { %296 = vsyncpa [#allocation4], 1 }
 0x1dc   :  { %298 = vsyncpa [#allocation4 + $0x1], 1 }

</bundles_post_ra>
